<compile_context>
chip_gen: v6e
topology: v6e:2x2x1
jax: 0.10.0
libtpu: 0.0.40
codegen_flags: <defaults>
</compile_context>

<pallas_src>
import functools
from dataclasses import dataclass
from typing import Any, List, Tuple

import numpy as np
import jax
import jax.numpy as jnp
from jax.experimental import pallas as pl
from jax.experimental.pallas import tpu as pltpu


# ----------------------------- config ---------------------------------------
HIDDEN = 32
FFN = 64
VOCAB = 64
IMG_C, IMG_H, IMG_W = 4, 16, 16
PATCH = 8
NUM_PATCHES = (IMG_H // PATCH) * (IMG_W // PATCH)          # 4
PATCH_DIM = IMG_C * PATCH * PATCH                          # 256

# lane-dense padded dims (last dim of every block a multiple of 128)
H_PAD = 128
F_PAD = 128
V_PAD = 128
NP_COLS = 128                     # scatter columns of the fused LHS
K_TOTAL = V_PAD + NP_COLS         # 256: one MXU pass on v6e/v7x, two on v5e
SUBLANE = 8


def _round_up(x, m):
    return ((x + m - 1) // m) * m


@dataclass
class SpecialTokenIds:
    section_start: int = 1
    section_end: int = 2
    image: int = 3
    caption: int = 4
    padding: int = 0


SPECIAL = SpecialTokenIds()


# ----------------------------- section dataclasses ---------------------------
@dataclass
class Section:
    batch_size: int


@dataclass
class CaptionSection(Section):
    section_token_ids: Any       # host numpy (B, L) int32 -- never device_get'd


@dataclass
class ImageSection(Section):
    prepared_image: Any          # (B, num_patches, PATCH_DIM) after pre_process


@dataclass
class SectionResult:
    pass


@dataclass
class CaptionSectionResult(SectionResult):
    section_logits: jnp.ndarray


@dataclass
class ImageSectionResult(SectionResult):
    pass


@dataclass
class MultiModalModelResult:
    sections: List[SectionResult]
    cache: Any


@dataclass
class _CachedLayout:
    s_total: int
    n_patch: int
    m: int
    m_pad: int
    np_pad: int
    base_lhs: np.ndarray                       # (m_pad, K_TOTAL) f32 template
    caption_rows: List[np.ndarray]             # flat row indices per caption sec
    section_offsets: List[Tuple[str, int, int]]
    caption_slices: Tuple[Tuple[int, int], ...]


# ----------------------------- fused Pallas kernel ---------------------------
def _fused_forward_kernel(
    lhs_ref,      # (M_pad, K_TOTAL)  f32   [one-hot(token id) | patch scatter]
    patch_ref,    # (NP_pad, PATCH_DIM) f32 patchified image rows
    emb_ref,      # (V_PAD, H_PAD)    f32   embedding table (zero-padded)
    pw_ref,       # (PATCH_DIM, H_PAD) f32  patch projection
    pb_ref,       # (1, H_PAD)        f32
    w1_ref,       # (H_PAD, F_PAD)    f32   residual MLP
    b1_ref,       # (1, F_PAD)        f32
    w2_ref,       # (F_PAD, H_PAD)    f32
    b2_ref,       # (1, H_PAD)        f32
    uw_ref,       # (H_PAD, V_PAD)    f32   unembed
    ub_ref,       # (1, V_PAD)        f32
    hidden_ref,   # (M_pad, H_PAD)    f32 out  final hidden state
    logits_ref,   # (M_pad, V_PAD)    f32 out  full-sequence logits
    rhs_ref,      # (K_TOTAL, H_PAD)  f32 scratch: fused embedding/scatter RHS
):
    np_pad = patch_ref.shape[0]

    # 1) image encoder: patch projection (rows selected later by the scatter
    #    columns of lhs; padded patch rows have zero scatter coefficients).
    p = (jnp.dot(patch_ref[...], pw_ref[...], preferred_element_type=jnp.float32)
         + pb_ref[...])

    # 2) build fused RHS [embedding table ; projected patches ; zeros] in VMEM,
    #    then embedding-gather + patch-scatter in ONE K=256 MXU contraction.
    rhs_ref[0:V_PAD, :] = emb_ref[...]
    rhs_ref[V_PAD:, :] = jnp.zeros((NP_COLS, H_PAD), jnp.float32)
    rhs_ref[V_PAD:V_PAD + np_pad, :] = p
    x = jnp.dot(lhs_ref[...], rhs_ref[...], preferred_element_type=jnp.float32)

    # 3) run_model: residual MLP (padded FFN/HIDDEN lanes stay exactly zero).
    # TODO(synk): run_model is abstract in the torch spec; a tanh-GELU residual
    # MLP is this concretization (use approximate=False for erf/nn.GELU parity).
    h = jnp.dot(x, w1_ref[...], preferred_element_type=jnp.float32) + b1_ref[...]
    h = jax.nn.gelu(h)
    y = x + jnp.dot(h, w2_ref[...], preferred_element_type=jnp.float32) + b2_ref[...]
    hidden_ref[...] = y

    # 4) unembed to token-id logits.
    logits_ref[...] = (
        jnp.dot(y, uw_ref[...], preferred_element_type=jnp.float32) + ub_ref[...]
    )


def fused_forward(lhs, patch_rows, emb, pw, pb, w1, b1, w2, b2, uw, ub):
    m_pad = lhs.shape[0]
    # Whole problem is one VMEM tile (~1 MiB): grid-less call, default
    # full-array VMEM blocks, lane-dense (128-padded) outputs.
    # TODO(synk): when batch*seq grows past a few hundred rows, add an M-axis
    # grid with dimension_semantics=("parallel",) (uses v7x's 2nd TensorCore)
    # and set vmem_limit_bytes against v7x's 64 MiB VMEM.
    return pl.pallas_call(
        _fused_forward_kernel,
        out_shape=(
            jax.ShapeDtypeStruct((m_pad, H_PAD), jnp.float32),
            jax.ShapeDtypeStruct((m_pad, V_PAD), jnp.float32),
        ),
        scratch_shapes=[pltpu.VMEM((K_TOTAL, H_PAD), jnp.float32)],
    )(lhs, patch_rows, emb, pw, pb, w1, b1, w2, b2, uw, ub)


# ------------------ jitted device path (single dispatch) ---------------------
@functools.partial(
    jax.jit,
    static_argnames=("batch_size", "s_total", "n_patch", "np_pad", "caption_slices"),
)
def _forward_compute(lhs, patch_blocks, params, *, batch_size, s_total, n_patch,
                     np_pad, caption_slices):
    (emb, pw, pb, w1, b1, w2, b2, uw, ub) = params
    np_total = batch_size * n_patch

    if patch_blocks:
        prows = jnp.concatenate(patch_blocks, axis=1).astype(jnp.float32)
        prows = prows.reshape(np_total, PATCH_DIM)
        if np_pad > np_total:
            prows = jnp.pad(prows, ((0, np_pad - np_total), (0, 0)))
    else:
        prows = jnp.zeros((np_pad, PATCH_DIM), jnp.float32)

    hidden_pad, logits_pad = fused_forward(
        lhs, prows, emb, pw, pb, w1, b1, w2, b2, uw, ub)

    m = batch_size * s_total
    hidden = hidden_pad[:m, :HIDDEN].reshape(batch_size, s_total, HIDDEN)
    logits = logits_pad[:m, :VOCAB].reshape(batch_size, s_total, VOCAB)
    caption_logits = tuple(logits[:, a:b, :] for (a, b) in caption_slices)
    return hidden, caption_logits


# ----------------------------- model ------------------------------------------
class MultiModalModelPallas:
    def __init__(self, key):
        ks = jax.random.split(key, 8)
        scale = 0.02

        def randn_padded(k, shape, padded_shape):
            w = scale * jax.random.normal(k, shape, jnp.float32)
            pad = [(0, p - s) for s, p in zip(shape, padded_shape)]
            return jnp.pad(w, pad)

        # embedding table + unembed (zero-padded to lane-dense shapes)
        self.embed_table = randn_padded(ks[0], (VOCAB, HIDDEN), (V_PAD, H_PAD))
        self.unembed_w = randn_padded(ks[1], (HIDDEN, VOCAB), (H_PAD, V_PAD))
        self.unembed_b = jnp.zeros((1, V_PAD), jnp.float32)
        # image encoder: patch projection
        self.patch_w = randn_padded(ks[2], (PATCH_DIM, HIDDEN), (PATCH_DIM, H_PAD))
        self.patch_b = randn_padded(ks[3], (HIDDEN,), (H_PAD,)).reshape(1, H_PAD)
        # run_model: residual MLP
        self.w1 = randn_padded(ks[4], (HIDDEN, FFN), (H_PAD, F_PAD))
        self.b1 = randn_padded(ks[5], (FFN,), (F_PAD,)).reshape(1, F_PAD)
        self.w2 = randn_padded(ks[6], (FFN, HIDDEN), (F_PAD, H_PAD))
        self.b2 = randn_padded(ks[7], (HIDDEN,), (H_PAD,)).reshape(1, H_PAD)

        self._params = (self.embed_table, self.patch_w, self.patch_b,
                        self.w1, self.b1, self.w2, self.b2,
                        self.unembed_w, self.unembed_b)
        self._layout_cache = {}

    @property
    def special_token_ids(self) -> SpecialTokenIds:
        return SPECIAL

    # --- preprocessing -------------------------------------------------------
    def preprocess_images(self, images):
        # image_encoder.pre_process: NCHW -> (B, num_patches, PATCH_DIM).
        # Patchify happens once here, not in the forward hot path.
        B = images.shape[0]
        x = images.reshape(B, IMG_C, IMG_H // PATCH, PATCH, IMG_W // PATCH, PATCH)
        x = jnp.transpose(x, (0, 2, 4, 1, 3, 5)).reshape(B, NUM_PATCHES, PATCH_DIM)
        return ImageSection(batch_size=B, prepared_image=x)

    def preprocess_captions(self, token_id_lists):
        # TODO(synk): torch spec tokenizes raw strings via an abstract
        # tokenizer; here we accept pre-tokenized id lists.
        batch_size = len(token_id_lists)
        max_len = max(len(ids) for ids in token_id_lists)
        section_length = max_len + 3
        t = self.special_token_ids
        ids = np.full((batch_size, section_length), t.padding, dtype=np.int32)
        for i, toks in enumerate(token_id_lists):
            ids[i, 0] = t.section_start
            ids[i, 1] = t.caption
            if toks:
                ids[i, 2:2 + len(toks)] = np.asarray(toks, np.int32)
            ids[i, 2 + len(toks)] = t.section_end
        # kept as host numpy so forward() never needs a device_get
        return CaptionSection(batch_size=batch_size, section_token_ids=ids)

    # --- layout (cached per section structure) -------------------------------
    @staticmethod
    def _structure_key(sections, batch_size):
        parts = []
        for s in sections:
            if isinstance(s, ImageSection):
                parts.append(("img", int(s.prepared_image.shape[1])))
            elif isinstance(s, CaptionSection):
                parts.append(("cap", int(s.section_token_ids.shape[1])))
            else:
                raise ValueError(f"Unknown section type: {s}")
        return (int(batch_size), tuple(parts))

    def _build_layout(self, sections, batch_size):
        t = self.special_token_ids
        pos = 0
        n_patch = 0
        specials = []       # (seq_pos, token_id) baked-in image-section specials
        patch_cols = []     # (seq_pos, global_patch_index)
        caption_ranges = []  # (start_pos, length)
        section_offsets = []

        for section in sections:
            start = pos
            if isinstance(section, ImageSection):
                specials.append((pos, t.section_start)); pos += 1
                specials.append((pos, t.image)); pos += 1
                npatch_i = int(section.prepared_image.shape[1])
                for p in range(npatch_i):
                    patch_cols.append((pos, n_patch + p)); pos += 1
                n_patch += npatch_i
                specials.append((pos, t.section_end)); pos += 1
                kind = "img"
            elif isinstance(section, CaptionSection):
                L = int(section.section_token_ids.shape[1])
                caption_ranges.append((start, L))
                pos += L
                kind = "cap"
            else:
                raise ValueError(f"Unknown section type: {section}")
            section_offsets.append((kind, start, pos))

        s_total = pos
        m = batch_size * s_total
        m_pad = _round_up(m, SUBLANE)
        np_total = batch_size * n_patch
        np_pad = _round_up(max(np_total, SUBLANE), SUBLANE)
        # TODO(synk): tile the fused K axis if total patches ever exceed 128.
        assert np_pad <= NP_COLS, "too many image patches for fused K=256 pass"

        base_lhs = np.zeros((m_pad, K_TOTAL), np.float32)
        for b in range(batch_size):
            row0 = b * s_total
            for (sp, tok) in specials:
                base_lhs[row0 + sp, tok] = 1.0
            for (sp, g) in patch_cols:
                base_lhs[row0 + sp, V_PAD + b * n_patch + g] = 1.0

        caption_rows = []
        for (start, L) in caption_ranges:
            rows = (np.arange(batch_size)[:, None] * s_total
                    + (start + np.arange(L))[None, :]).reshape(-1)
            caption_rows.append(rows)
        caption_slices = tuple((start, start + L) for (start, L) in caption_ranges)

        return _CachedLayout(
            s_total=s_total, n_patch=n_patch, m=m, m_pad=m_pad, np_pad=np_pad,
            base_lhs=base_lhs, caption_rows=caption_rows,
            section_offsets=section_offsets, caption_slices=caption_slices)

    # --- forward -------------------------------------------------------------
    def forward(self, sections):
        batch_size = sections[0].batch_size
        key = self._structure_key(sections, batch_size)
        layout = self._layout_cache.get(key)
        if layout is None:
            layout = self._build_layout(sections, batch_size)
            self._layout_cache[key] = layout

        # Per-call host work: copy the cached template and drop in the caption
        # token one-hots (padding id 0 is embedded like the torch model).
        lhs = layout.base_lhs.copy()
        patch_blocks = []
        cap_i = 0
        for section in sections:
            if isinstance(section, ImageSection):
                patch_blocks.append(section.prepared_image)
            elif isinstance(section, CaptionSection):
                ids = np.asarray(section.section_token_ids).reshape(-1)
                lhs[layout.caption_rows[cap_i], ids] = 1.0
                cap_i += 1

        hidden, caption_logits = _forward_compute(
            jnp.asarray(lhs), tuple(patch_blocks), self._params,
            batch_size=batch_size, s_total=layout.s_total,
            n_patch=layout.n_patch, np_pad=layout.np_pad,
            caption_slices=layout.caption_slices)

        cache = {"cached_len": layout.s_total, "final_hidden_state": hidden}

        section_results = []
        cap_i = 0
        for (kind, _start, _end) in layout.section_offsets:
            if kind == "img":
                section_results.append(ImageSectionResult())
            else:
                section_results.append(
                    CaptionSectionResult(section_logits=caption_logits[cap_i]))
                cap_i += 1
        return MultiModalModelResult(sections=section_results, cache=cache)


# ----------------------------- pure-JAX reference ----------------------------
def _reference_caption_logits(model, images, cap_ids):
    # Reference for the [ImageSection, CaptionSection] layout used in main.
    t = model.special_token_ids
    emb = model.embed_table[:VOCAB, :HIDDEN]
    B = images.shape[0]
    x = images.reshape(B, IMG_C, IMG_H // PATCH, PATCH, IMG_W // PATCH, PATCH)
    x = jnp.transpose(x, (0, 2, 4, 1, 3, 5)).reshape(B, NUM_PATCHES, PATCH_DIM)
    p = x @ model.patch_w[:, :HIDDEN] + model.patch_b[0, :HIDDEN]

    def tok(i):
        return jnp.broadcast_to(emb[i][None, None, :], (B, 1, HIDDEN))

    cap = jnp.take(emb, jnp.asarray(cap_ids, jnp.int32), axis=0)
    seq = jnp.concatenate(
        [tok(t.section_start), tok(t.image), p, tok(t.section_end), cap], axis=1)
    h = jax.nn.gelu(seq @ model.w1[:HIDDEN, :FFN] + model.b1[0, :FFN])
    y = seq + h @ model.w2[:FFN, :HIDDEN] + model.b2[0, :HIDDEN]
    logits = y @ model.unembed_w[:HIDDEN, :VOCAB] + model.unembed_b[0, :VOCAB]
    return logits[:, 2 + NUM_PATCHES + 1:, :]


# ----------------------------- main ------------------------------------------
if __name__ == "__main__":
    key = jax.random.PRNGKey(0)
    k_model, k_img = jax.random.split(key)

    model = MultiModalModelPallas(k_model)

    batch = 2
    # images NCHW = (batch, channels, height, width)
    images = jax.random.normal(k_img, (batch, IMG_C, IMG_H, IMG_W), jnp.float32)

    # deterministic "tokenized" captions (token ids in [5, VOCAB))
    caption_token_ids = [
        [10, 11, 12, 13],
        [20, 21, 22, 23, 24],
    ]

    image_section = model.preprocess_images(images)
    caption_section = model.preprocess_captions(caption_token_ids)

    result = model.forward([image_section, caption_section])
    # second call exercises the cached-layout / cached-jit fast path
    result2 = model.forward([image_section, caption_section])

    cap_results = [r for r in result.sections if isinstance(r, CaptionSectionResult)]
    assert len(cap_results) == 1
    logits = jax.block_until_ready(cap_results[0].section_logits)
    logits2 = jax.block_until_ready(
        [r for r in result2.sections
         if isinstance(r, CaptionSectionResult)][0].section_logits)

    expected_len = max(len(x) for x in caption_token_ids) + 3
    assert logits.shape == (batch, expected_len, VOCAB)
    assert bool(jnp.all(jnp.isfinite(logits)))
    assert bool(jnp.allclose(logits, logits2))

    ref = _reference_caption_logits(model, images, caption_section.section_token_ids)
    assert bool(jnp.allclose(logits, ref, atol=2e-3, rtol=1e-2)), \
        "mismatch vs jnp reference"

    print("KERNEL_OK")
</pallas_src>

<mosaic_0001>
module attributes {stable_mosaic.version = 11 : i64} {
  func.func @_fused_forward_kernel(%arg0: memref<32x256xf32, #tpu.memory_space<vmem>>, %arg1: memref<8x256xf32, #tpu.memory_space<vmem>>, %arg2: memref<128x128xf32, #tpu.memory_space<vmem>>, %arg3: memref<256x128xf32, #tpu.memory_space<vmem>>, %arg4: memref<1x128xf32, #tpu.memory_space<vmem>>, %arg5: memref<128x128xf32, #tpu.memory_space<vmem>>, %arg6: memref<1x128xf32, #tpu.memory_space<vmem>>, %arg7: memref<128x128xf32, #tpu.memory_space<vmem>>, %arg8: memref<1x128xf32, #tpu.memory_space<vmem>>, %arg9: memref<128x128xf32, #tpu.memory_space<vmem>>, %arg10: memref<1x128xf32, #tpu.memory_space<vmem>>, %arg11: memref<32x128xf32, #tpu.memory_space<vmem>>, %arg12: memref<32x128xf32, #tpu.memory_space<vmem>>, %arg13: memref<256x128xf32, #tpu.memory_space<vmem>>) attributes {dimension_semantics = [], scalar_prefetch = 0 : i64, scratch_operands = 1 : i64, tpu.core_type = #tpu.core_type<tc>} {
    %c0 = arith.constant 0 : index
    %c0_0 = arith.constant 0 : index
    %0 = vector.load %arg1[%c0, %c0_0] : memref<8x256xf32, #tpu.memory_space<vmem>>, vector<8x256xf32>
    %c0_1 = arith.constant 0 : index
    %c0_2 = arith.constant 0 : index
    %1 = vector.load %arg3[%c0_1, %c0_2] : memref<256x128xf32, #tpu.memory_space<vmem>>, vector<256x128xf32>
    %cst = arith.constant dense<0.000000e+00> : vector<8x128xf32>
    %2 = tpu.matmul %0, %1, %cst {dimension_numbers = #tpu.dot_dimension_numbers<[1], [0], [0], [1], [0, 0, 1, 1], [], []>} : vector<8x256xf32>, vector<256x128xf32>, vector<8x128xf32> -> vector<8x128xf32>
    %c0_3 = arith.constant 0 : index
    %c0_4 = arith.constant 0 : index
    %3 = vector.load %arg4[%c0_3, %c0_4] : memref<1x128xf32, #tpu.memory_space<vmem>>, vector<1x128xf32>
    %4 = vector.broadcast %3 : vector<1x128xf32> to vector<8x128xf32>
    %5 = arith.addf %2, %4 : vector<8x128xf32>
    %c0_5 = arith.constant 0 : index
    %c0_6 = arith.constant 0 : index
    %6 = vector.load %arg2[%c0_5, %c0_6] : memref<128x128xf32, #tpu.memory_space<vmem>>, vector<128x128xf32>
    %c0_7 = arith.constant 0 : index
    %c0_8 = arith.constant 0 : index
    %7 = vector.load %arg13[%c0_7, %c0_8] : memref<256x128xf32, #tpu.memory_space<vmem>>, vector<128x128xf32>
    tpu.vector_store %arg13[%c0_7, %c0_8], %6 {strides = array<i32>} : memref<256x128xf32, #tpu.memory_space<vmem>>, vector<128x128xf32>,
    %cst_9 = arith.constant 0.000000e+00 : f32
    %8 = vector.broadcast %cst_9 : f32 to vector<128x128xf32>
    %c128 = arith.constant 128 : index
    %c0_10 = arith.constant 0 : index
    %9 = vector.load %arg13[%c128, %c0_10] : memref<256x128xf32, #tpu.memory_space<vmem>>, vector<128x128xf32>
    tpu.vector_store %arg13[%c128, %c0_10], %8 {strides = array<i32>} : memref<256x128xf32, #tpu.memory_space<vmem>>, vector<128x128xf32>,
    %c128_11 = arith.constant 128 : index
    %c0_12 = arith.constant 0 : index
    %10 = vector.load %arg13[%c128_11, %c0_12] : memref<256x128xf32, #tpu.memory_space<vmem>>, vector<8x128xf32>
    tpu.vector_store %arg13[%c128_11, %c0_12], %5 {strides = array<i32>} : memref<256x128xf32, #tpu.memory_space<vmem>>, vector<8x128xf32>,
    %c0_13 = arith.constant 0 : index
    %c0_14 = arith.constant 0 : index
    %11 = vector.load %arg0[%c0_13, %c0_14] : memref<32x256xf32, #tpu.memory_space<vmem>>, vector<32x256xf32>
    %c0_15 = arith.constant 0 : index
    %c0_16 = arith.constant 0 : index
    %12 = vector.load %arg13[%c0_15, %c0_16] : memref<256x128xf32, #tpu.memory_space<vmem>>, vector<256x128xf32>
    %cst_17 = arith.constant dense<0.000000e+00> : vector<32x128xf32>
    %13 = tpu.matmul %11, %12, %cst_17 {dimension_numbers = #tpu.dot_dimension_numbers<[1], [0], [0], [1], [0, 0, 1, 1], [], []>} : vector<32x256xf32>, vector<256x128xf32>, vector<32x128xf32> -> vector<32x128xf32>
    %c0_18 = arith.constant 0 : index
    %c0_19 = arith.constant 0 : index
    %14 = vector.load %arg5[%c0_18, %c0_19] : memref<128x128xf32, #tpu.memory_space<vmem>>, vector<128x128xf32>
    %cst_20 = arith.constant dense<0.000000e+00> : vector<32x128xf32>
    %15 = tpu.matmul %13, %14, %cst_20 {dimension_numbers = #tpu.dot_dimension_numbers<[1], [0], [0], [1], [0, 0, 1, 1], [], []>} : vector<32x128xf32>, vector<128x128xf32>, vector<32x128xf32> -> vector<32x128xf32>
    %c0_21 = arith.constant 0 : index
    %c0_22 = arith.constant 0 : index
    %16 = vector.load %arg6[%c0_21, %c0_22] : memref<1x128xf32, #tpu.memory_space<vmem>>, vector<1x128xf32>
    %17 = vector.broadcast %16 : vector<1x128xf32> to vector<32x128xf32>
    %18 = arith.addf %15, %17 : vector<32x128xf32>
    %19 = arith.mulf %18, %18 : vector<32x128xf32>
    %20 = arith.mulf %18, %19 : vector<32x128xf32>
    %cst_23 = arith.constant 4.471500e-02 : f32
    %21 = vector.broadcast %cst_23 : f32 to vector<32x128xf32>
    %22 = arith.mulf %21, %20 : vector<32x128xf32>
    %23 = arith.addf %18, %22 : vector<32x128xf32>
    %cst_24 = arith.constant 0.797884583 : f32
    %24 = vector.broadcast %cst_24 : f32 to vector<32x128xf32>
    %25 = arith.mulf %24, %23 : vector<32x128xf32>
    %26 = math.tanh %25 : vector<32x128xf32>
    %cst_25 = arith.constant 1.000000e+00 : f32
    %27 = vector.broadcast %cst_25 : f32 to vector<32x128xf32>
    %28 = arith.addf %27, %26 : vector<32x128xf32>
    %cst_26 = arith.constant 5.000000e-01 : f32
    %29 = vector.broadcast %cst_26 : f32 to vector<32x128xf32>
    %30 = arith.mulf %29, %28 : vector<32x128xf32>
    %31 = arith.mulf %18, %30 : vector<32x128xf32>
    %c0_27 = arith.constant 0 : index
    %c0_28 = arith.constant 0 : index
    %32 = vector.load %arg7[%c0_27, %c0_28] : memref<128x128xf32, #tpu.memory_space<vmem>>, vector<128x128xf32>
    %cst_29 = arith.constant dense<0.000000e+00> : vector<32x128xf32>
    %33 = tpu.matmul %31, %32, %cst_29 {dimension_numbers = #tpu.dot_dimension_numbers<[1], [0], [0], [1], [0, 0, 1, 1], [], []>} : vector<32x128xf32>, vector<128x128xf32>, vector<32x128xf32> -> vector<32x128xf32>
    %34 = arith.addf %13, %33 : vector<32x128xf32>
    %c0_30 = arith.constant 0 : index
    %c0_31 = arith.constant 0 : index
    %35 = vector.load %arg8[%c0_30, %c0_31] : memref<1x128xf32, #tpu.memory_space<vmem>>, vector<1x128xf32>
    %36 = vector.broadcast %35 : vector<1x128xf32> to vector<32x128xf32>
    %37 = arith.addf %34, %36 : vector<32x128xf32>
    %c0_32 = arith.constant 0 : index
    %c0_33 = arith.constant 0 : index
    %38 = vector.load %arg11[%c0_32, %c0_33] : memref<32x128xf32, #tpu.memory_space<vmem>>, vector<32x128xf32>
    tpu.vector_store %arg11[%c0_32, %c0_33], %37 {strides = array<i32>} : memref<32x128xf32, #tpu.memory_space<vmem>>, vector<32x128xf32>,
    %c0_34 = arith.constant 0 : index
    %c0_35 = arith.constant 0 : index
    %39 = vector.load %arg9[%c0_34, %c0_35] : memref<128x128xf32, #tpu.memory_space<vmem>>, vector<128x128xf32>
    %cst_36 = arith.constant dense<0.000000e+00> : vector<32x128xf32>
    %40 = tpu.matmul %37, %39, %cst_36 {dimension_numbers = #tpu.dot_dimension_numbers<[1], [0], [0], [1], [0, 0, 1, 1], [], []>} : vector<32x128xf32>, vector<128x128xf32>, vector<32x128xf32> -> vector<32x128xf32>
    %c0_37 = arith.constant 0 : index
    %c0_38 = arith.constant 0 : index
    %41 = vector.load %arg10[%c0_37, %c0_38] : memref<1x128xf32, #tpu.memory_space<vmem>>, vector<1x128xf32>
    %42 = vector.broadcast %41 : vector<1x128xf32> to vector<32x128xf32>
    %43 = arith.addf %40, %42 : vector<32x128xf32>
    %c0_39 = arith.constant 0 : index
    %c0_40 = arith.constant 0 : index
    %44 = vector.load %arg12[%c0_39, %c0_40] : memref<32x128xf32, #tpu.memory_space<vmem>>, vector<32x128xf32>
    tpu.vector_store %arg12[%c0_39, %c0_40], %43 {strides = array<i32>} : memref<32x128xf32, #tpu.memory_space<vmem>>, vector<32x128xf32>,
    return
  }
}

</mosaic_0001>

<bundles_post_ra>
// kernel: _forward_compute.1
= control target key start
LH: loop header
LB: loop body
LE: loop exit
PB: predicated region body
PF: predicated region fallthrough
CT: control target
= control target key end

     0   :  { %18 = vsyncpa [#allocation4], 0  ;;  %s1443_s0 = inlined_call_operand.hbm [shape: f32[32,256], index: 0, kind: input, shape index: {}]   ;;  %s1444_s1 = inlined_call_operand.vmem [shape: f32[8,256], index: 1, kind: input, shape index: {}]   ;;  %s1445_s2 = inlined_call_operand.hbm [shape: f32[128,128], index: 2, kind: input, shape index: {}]   ;;  %s1446_s3 = inlined_call_operand.hbm [shape: f32[256,128], index: 3, kind: input, shape index: {}]   ;;  %s1447_s4 = inlined_call_operand.vmem [shape: f32[1,128], index: 4, kind: input, shape index: {}]   ;;  %s1448_s5 = inlined_call_operand.hbm [shape: f32[128,128], index: 5, kind: input, shape index: {}]   ;;  %s1449_s6 = inlined_call_operand.vmem [shape: f32[1,128], index: 6, kind: input, shape index: {}]   ;;  %s1450_s7 = inlined_call_operand.hbm [shape: f32[128,128], index: 7, kind: input, shape index: {}]   ;;  %s1451_s8 = inlined_call_operand.vmem [shape: f32[1,128], index: 8, kind: input, shape index: {}]   ;;  %s1452_s9 = inlined_call_operand.hbm [shape: f32[128,128], index: 9, kind: input, shape index: {}]   ;;  %s1453_s10 = inlined_call_operand.vmem [shape: f32[1,128], index: 10, kind: input, shape index: {}]   ;;  %s1454_s11 = inlined_call_operand.vmem [shape: f32[32,128], index: 11, kind: output, shape index: {0}]   ;;  %s1455_s12 = inlined_call_operand.vmem [shape: f32[32,128], index: 12, kind: output, shape index: {1}]  }
   0x1   :  { %19 = vsyncpa [#allocation6], 0 }
   0x2   :  { %20 = vsyncpa [#allocation9], 0 }
   0x3   :  { %21 = vsyncpa [#allocation12], 0  ;;  %s1187_s21 = smov [#allocation5]  }
   0x4   :  { %s41_s22 = sshll.u32 %s1187_s21, 4  ;;  %s42_s22 = int_to_ptr.vmem [resolvable:$true] %s41_s22 }
   0x5   :  { %s1067_s23 = scalar_lea.vmem %s42_s22, 2048  ;;  %p1072_p1 = scmp.lt.s32.totalorder %s42_s22, %s42_s22 }
   0x6   :  { %p1068_p0 = scmp.ne.s32.totalorder %s42_s22, %s1067_s23  ;;  %p1073_p2 = scmp.lt.s32.totalorder %s1067_s23, %s1067_s23 }
   0x8   :  { %p1074_p3 = por %p1073_p2, %p1072_p1 }
   0xa   :  { %p1075_p4 = pnand %p1074_p3, %p1068_p0 }
   0xc   :  { %1078 = shalt.err (!%p1075_p4)
}
   0xd   :  { %s1188_s24 = smov 128   ;;  %s1189_s25 = smov 8  }
   0xe   :  { %47 = dma.hbm_to_vmem [thread:$0]  %s1445_s2, 2048, %s42_s22, [#allocation6], %s1188_s24, %s1188_s24, %s1189_s25  }
   0xf   :  { %s1190_s28 = smov [#allocation8]   ;;  %s1191_s30 = smov [#allocation3]  }
  0x10   :  { %s67_s29 = sshll.u32 %s1190_s28, 4  ;;  %s27_s13 = sshll.u32 %s1191_s30, 4  ;;  %s68_s29 = int_to_ptr.vmem [resolvable:$true] %s67_s29  ;;  %s28_s13 = int_to_ptr.vmem [resolvable:$true] %s27_s13 }
  0x11   :  { %s1087_s14 = scalar_lea.vmem %s68_s29, 2048  ;;  %p1092_p6 = scmp.lt.s32.totalorder %s68_s29, %s68_s29 }
  0x12   :  { %p1088_p5 = scmp.ne.s32.totalorder %s68_s29, %s1087_s14  ;;  %p1093_p7 = scmp.lt.s32.totalorder %s1087_s14, %s1087_s14 }
  0x14   :  { %p1094_p8 = por %p1093_p7, %p1092_p6 }
  0x16   :  { %p1095_p9 = pnand %p1094_p8, %p1088_p5 }
  0x18   :  { %1098 = shalt.err (!%p1095_p9)
}
  0x19   :  { %73 = dma.hbm_to_vmem [thread:$0]  %s1448_s5, 2048, %s68_s29, [#allocation9], %s1188_s24, %s1188_s24, %s1189_s25  }
  0x1a   :  { %s1107_s2 = scalar_lea.vmem %s28_s13, 1024  ;;  %p1112_p11 = scmp.lt.s32.totalorder %s28_s13, %s28_s13 }
  0x1b   :  { %p1108_p10 = scmp.ne.s32.totalorder %s28_s13, %s1107_s2  ;;  %p1113_p12 = scmp.lt.s32.totalorder %s1107_s2, %s1107_s2 }
  0x1d   :  { %p1114_p13 = por %p1113_p12, %p1112_p11 }
  0x1f   :  { %p1115_p0 = pnand %p1114_p13, %p1108_p10 }
  0x21   :  { %1118 = shalt.err (!%p1115_p0)
}
  0x22   :  { %s1192_s17 = smov 256   ;;  %s1193_s18 = smov 16  }
  0x23   :  { %33 = dma.hbm_to_vmem [thread:$0]  %s1443_s0, 1024, %s28_s13, [#allocation4], %s1192_s17, %s1192_s17, %s1193_s18  }
  0x24   :  { %s1194_s21 = smov [#allocation7]   ;;  %s1195_s23 = smov [#allocation10]  }
  0x25   :  { %s53_s22 = sshll.u32 %s1194_s21, 4  ;;  %s81_s26 = sshll.u32 %s1195_s23, 4  ;;  %s54_s22 = int_to_ptr.vmem [resolvable:$true] %s53_s22  ;;  %s82_s26 = int_to_ptr.vmem [resolvable:$true] %s81_s26 }
  0x26   :  { %s1127_s5 = scalar_lea.vmem %s54_s22, 4096  ;;  %p1132_p2 = scmp.lt.s32.totalorder %s54_s22, %s54_s22 }
  0x27   :  { %p1128_p1 = scmp.ne.s32.totalorder %s54_s22, %s1127_s5  ;;  %p1133_p3 = scmp.lt.s32.totalorder %s1127_s5, %s1127_s5 }
  0x29   :  { %p1134_p4 = por %p1133_p3, %p1132_p2 }
  0x2b   :  { %p1135_p5 = pnand %p1134_p4, %p1128_p1 }
  0x2d   :  { %1138 = shalt.err (!%p1135_p5)
}
  0x2e   :  { %59 = dma.hbm_to_vmem [thread:$0]  %s1446_s3, 4096, %s54_s22, [#allocation6], %s1188_s24, %s1188_s24, %s1189_s25  }
  0x2f   :  { %s1147_s0 = scalar_lea.vmem %s82_s26, 2048  ;;  %p1152_p7 = scmp.lt.s32.totalorder %s82_s26, %s82_s26 }
  0x30   :  { %p1148_p6 = scmp.ne.s32.totalorder %s82_s26, %s1147_s0  ;;  %p1153_p8 = scmp.lt.s32.totalorder %s1147_s0, %s1147_s0 }
  0x32   :  { %p1154_p9 = por %p1153_p8, %p1152_p7 }
  0x34   :  { %p1155_p10 = pnand %p1154_p9, %p1148_p6 }
  0x36   :  { %1158 = shalt.err (!%p1155_p10)
}
  0x37   :  { %87 = dma.hbm_to_vmem [thread:$0]  %s1450_s7, 2048, %s82_s26, [#allocation9], %s1188_s24, %s1188_s24, %s1189_s25  }
  0x38   :  { %s1196_s13 = smov [#allocation11]  }
  0x39   :  { %s95_s14 = sshll.u32 %s1196_s13, 4  ;;  %s96_s14 = int_to_ptr.vmem [resolvable:$true] %s95_s14 }
  0x3a   :  { %s1167_s15 = scalar_lea.vmem %s96_s14, 2048  ;;  %p1172_p12 = scmp.lt.s32.totalorder %s96_s14, %s96_s14 }
  0x3b   :  { %p1168_p11 = scmp.ne.s32.totalorder %s96_s14, %s1167_s15  ;;  %p1173_p13 = scmp.lt.s32.totalorder %s1167_s15, %s1167_s15 }
  0x3d   :  { %p1174_p0 = por %p1173_p13, %p1172_p12 }
  0x3f   :  { %p1175_p1 = pnand %p1174_p0, %p1168_p11 }
  0x41   :  { %1178 = shalt.err (!%p1175_p1)
}
  0x42   :  { %101 = dma.hbm_to_vmem [thread:$0]  %s1452_s9, 2048, %s96_s14, [#allocation12], %s1188_s24, %s1188_s24, %s1189_s25  }
  0x43   :  { %1179 = dma.done.wait [#allocation4], 1024  }
  0x44   :  { %1180 = vsyncadd [#allocation4], 4294966272 }
  0x45   :  { %1181 = dma.done.wait [#allocation6], 6144  }
  0x46   :  { %1182 = vsyncadd [#allocation6], 4294961152 }
  0x47   :  { %1183 = dma.done.wait [#allocation9], 4096  }
  0x48   :  { %1184 = vsyncadd [#allocation9], 4294963200 }
  0x49   :  { %1185 = dma.done.wait [#allocation12], 2048  }
  0x4a   :  { %1186 = vsyncadd [#allocation12], 4294965248  ;;  %v1197_v0 = vmov 0.0   ;;  %v155_v1 = vld [vmem:[#allocation7 + $0xf8] sm:$0xff]  ;;  %v154_v3 = vld [vmem:[#allocation7 + $0xf0] sm:$0xff] }
  0x4b   :  { %322 = vmatprep.subr.mxu1 %v1197_v0  ;;  %v139_v2 = vld [vmem:[#allocation7 + $0x78] sm:$0xff]  ;;  %799 = vmatprep.subr.mxu0 %v155_v1  ;;  %v138_v4 = vld [vmem:[#allocation7 + $0x70] sm:$0xff]  ;;  %v153_v5 = vld [vmem:[#allocation7 + $0xe8] sm:$0xff] }
  0x4c   :  { %800 = vmatpush3.msra.mxu0 %v139_v2  ;;  %v137_v6 = vld [vmem:[#allocation7 + $0x68] sm:$0xff]  ;;  %v152_v7 = vld [vmem:[#allocation7 + $0xe0] sm:$0xff]  ;;  %v151_v9 = vld [vmem:[#allocation7 + $0xd8] sm:$0xff] }
  0x4d   :  { %801 = vmatprep.subr.mxu0 %v154_v3  ;;  %v136_v8 = vld [vmem:[#allocation7 + $0x60] sm:$0xff]  ;;  %v135_v10 = vld [vmem:[#allocation7 + $0x58] sm:$0xff]  ;;  %v150_v11 = vld [vmem:[#allocation7 + $0xd0] sm:$0xff] }
  0x4e   :  { %802 = vmatpush3.msra.mxu0 %v138_v4  ;;  %v134_v12 = vld [vmem:[#allocation7 + $0x50] sm:$0xff]  ;;  %v149_v13 = vld [vmem:[#allocation7 + $0xc8] sm:$0xff]  ;;  %v248_v16 = vld [vmem:[#allocation5 + $0x78] sm:$0xff] }
  0x4f   :  { %803 = vmatprep.subr.mxu0 %v153_v5  ;;  %v123_v14 = vld [vmem:[%s1444_s1 + $0x8] sm:$0xff]  ;;  %v247_v17 = vld [vmem:[#allocation5 + $0x70] sm:$0xff]  ;;  %v148_v18 = vld [vmem:[#allocation7 + $0xc0] sm:$0xff]  ;;  %323 = vmatpush1.msra.mxu1 %v248_v16 }
  0x50   :  { %804 = vmatpush3.msra.mxu0 %v137_v6  ;;  %v133_v15 = vld [vmem:[#allocation7 + $0x48] sm:$0xff]  ;;  %227 = vmatprep.mubr.f32.mxu0 %v123_v14  ;;  %v132_v19 = vld [vmem:[#allocation7 + $0x40] sm:$0xff]  ;;  %v147_v21 = vld [vmem:[#allocation7 + $0xb8] sm:$0xff] }
  0x51   :  { %805 = vmatprep.subr.mxu0 %v152_v7  ;;  %324 = vmatprep.subr.mxu1 %v1197_v0  ;;  %v246_v20 = vld [vmem:[#allocation5 + $0x68] sm:$0xff]  ;;  %v131_v22 = vld [vmem:[#allocation7 + $0x38] sm:$0xff]  ;;  %v245_v23 = vld [vmem:[#allocation5 + $0x60] sm:$0xff] }
  0x52   :  { %806 = vmatpush3.msra.mxu0 %v136_v8  ;;  %325 = vmatpush1.msra.mxu1 %v247_v17  ;;  %v146_v24 = vld [vmem:[#allocation7 + $0xb0] sm:$0xff]  ;;  %v244_v26 = vld [vmem:[#allocation5 + $0x58] sm:$0xff]  ;;  %v145_v27 = vld [vmem:[#allocation7 + $0xa8] sm:$0xff] }
  0x53   :  { %807 = vmatprep.subr.mxu0 %v151_v9  ;;  %326 = vmatprep.subr.mxu1 %v1197_v0  ;;  %v130_v25 = vld [vmem:[#allocation7 + $0x30] sm:$0xff]  ;;  %v129_v28 = vld [vmem:[#allocation7 + $0x28] sm:$0xff]  ;;  %v144_v30 = vld [vmem:[#allocation7 + $0xa0] sm:$0xff] }
  0x54   :  { %808 = vmatpush3.msra.mxu0 %v135_v10  ;;  %327 = vmatpush1.msra.mxu1 %v246_v20  ;;  %v243_v29 = vld [vmem:[#allocation5 + $0x50] sm:$0xff]  ;;  %v128_v31 = vld [vmem:[#allocation7 + $0x20] sm:$0xff]  ;;  %v242_v32 = vld [vmem:[#allocation5 + $0x48] sm:$0xff] }
  0x55   :  { %809 = vmatprep.subr.mxu0 %v150_v11  ;;  %328 = vmatprep.subr.mxu1 %v1197_v0  ;;  %v143_v33 = vld [vmem:[#allocation7 + $0x98] sm:$0xff]  ;;  %v241_v35 = vld [vmem:[#allocation5 + $0x40] sm:$0xff]  ;;  %v142_v36 = vld [vmem:[#allocation7 + $0x90] sm:$0xff] }
  0x56   :  { %810 = vmatpush3.msra.mxu0 %v134_v12  ;;  %329 = vmatpush1.msra.mxu1 %v245_v23  ;;  %v127_v34 = vld [vmem:[#allocation7 + $0x18] sm:$0xff]  ;;  %v126_v37 = vld [vmem:[#allocation7 + $0x10] sm:$0xff]  ;;  %v141_v39 = vld [vmem:[#allocation7 + $0x88] sm:$0xff] }
  0x57   :  { %811 = vmatprep.subr.mxu0 %v149_v13  ;;  %330 = vmatprep.subr.mxu1 %v1197_v0  ;;  %v240_v38 = vld [vmem:[#allocation5 + $0x38] sm:$0xff]  ;;  %v125_v40 = vld [vmem:[#allocation7 + $0x8] sm:$0xff]  ;;  %v239_v41 = vld [vmem:[#allocation5 + $0x30] sm:$0xff] }
  0x58   :  { %812 = vmatpush3.msra.mxu0 %v133_v15  ;;  %331 = vmatpush1.msra.mxu1 %v244_v26  ;;  %v140_v42 = vld [vmem:[#allocation7 + $0x80] sm:$0xff]  ;;  %v238_v44 = vld [vmem:[#allocation5 + $0x28] sm:$0xff]  ;;  %v236_v47 = vld [vmem:[#allocation5 + $0x18] sm:$0xff] }
  0x59   :  { %813 = vmatprep.subr.mxu0 %v148_v18  ;;  %332 = vmatprep.subr.mxu1 %v1197_v0  ;;  %v124_v43 = vld [vmem:[#allocation7] sm:$0xff]  ;;  %v235_v48 = vld [vmem:[#allocation5 + $0x10] sm:$0xff]  ;;  %v234_v49 = vld [vmem:[#allocation5 + $0x8] sm:$0xff] }
  0x5a   :  { %814 = vmatpush3.msra.mxu0 %v132_v19  ;;  %333 = vmatpush1.msra.mxu1 %v243_v29  ;;  %v122_v45 = vld [vmem:[%s1444_s1] sm:$0xff]  ;;  %v283_v51 = vld [vmem:[#allocation3 + $0x8] sm:$0xff]  ;;  %v422_v52 = vld [vmem:[#allocation8 + $0x78] sm:$0xff] }
  0x5b   :  { %815 = vmatprep.subr.mxu0 %v147_v21  ;;  %334 = vmatprep.subr.mxu1 %v1197_v0  ;;  %v237_v46 = vld [vmem:[#allocation5 + $0x20] sm:$0xff]  ;;  %v421_v53 = vld [vmem:[#allocation8 + $0x70] sm:$0xff]  ;;  %v420_v54 = vld [vmem:[#allocation8 + $0x68] sm:$0xff] }
  0x5c   :  { %816 = vmatpush3.msra.mxu0 %v131_v22  ;;  %335 = vmatpush1.msra.mxu1 %v242_v32  ;;  %v233_v50 = vld [vmem:[#allocation5] sm:$0xff]  ;;  %v418_v56 = vld [vmem:[#allocation8 + $0x58] sm:$0xff]  ;;  %v417_v57 = vld [vmem:[#allocation8 + $0x50] sm:$0xff] }
  0x5d   :  { %817 = vmatprep.subr.mxu0 %v146_v24  ;;  %336 = vmatprep.subr.mxu1 %v1197_v0  ;;  %v419_v55 = vld [vmem:[#allocation8 + $0x60] sm:$0xff]  ;;  %v416_v58 = vld [vmem:[#allocation8 + $0x48] sm:$0xff]  ;;  %v414_v60 = vld [vmem:[#allocation8 + $0x38] sm:$0xff] }
  0x5e   :  { %818 = vmatpush3.msra.mxu0 %v130_v25  ;;  %337 = vmatpush1.msra.mxu1 %v241_v35  ;;  %v415_v59 = vld [vmem:[#allocation8 + $0x40] sm:$0xff]  ;;  %v413_v61 = vld [vmem:[#allocation8 + $0x30] sm:$0xff]  ;;  %v412_v62 = vld [vmem:[#allocation8 + $0x28] sm:$0xff] }
  0x5f   :  { %819 = vmatprep.subr.mxu0 %v145_v27  ;;  %338 = vmatprep.subr.mxu1 %v1197_v0  ;;  %v411_v63 = vld [vmem:[#allocation8 + $0x20] sm:$0xff]  ;;  %v409_v1 = vld [vmem:[#allocation8 + $0x10] sm:$0xff]  ;;  %v285_v8 = vld [vmem:[#allocation3 + $0x18] sm:$0xff] }
  0x60   :  { %820 = vmatpush3.msra.mxu0 %v129_v28  ;;  %339 = vmatpush1.msra.mxu1 %v240_v38  ;;  %v795_v3 = vld [vmem:[%s1447_s4] ss:$0 sm:$0xff]  ;;  %v284_v9 = vld [vmem:[#allocation3 + $0x10] sm:$0xff]  ;;  %v287_v10 = vld [vmem:[#allocation3 + $0x28] sm:$0xff] }
  0x61   :  { %821 = vmatprep.subr.mxu0 %v144_v30  ;;  %340 = vmatprep.subr.mxu1 %v1197_v0  ;;  %v282_v7 = vld [vmem:[#allocation3] sm:$0xff]  ;;  %v289_v12 = vld [vmem:[#allocation3 + $0x38] sm:$0xff]  ;;  %v288_v13 = vld [vmem:[#allocation3 + $0x30] sm:$0xff] }
  0x62   :  { %822 = vmatpush3.msra.mxu0 %v128_v31  ;;  %341 = vmatpush1.msra.mxu1 %v239_v41  ;;  %v286_v11 = vld [vmem:[#allocation3 + $0x20] sm:$0xff]  ;;  %v408_v14 = vld [vmem:[#allocation8 + $0x8] sm:$0xff]  ;;  %v566_v24 = vld [vmem:[#allocation10 + $0x78] sm:$0xff] }
  0x63   :  { %823 = vmatprep.subr.mxu0 %v143_v33  ;;  %342 = vmatprep.subr.mxu1 %v1197_v0  ;;  %v407_v15 = vld [vmem:[#allocation8] sm:$0xff]  ;;  %v565_v25 = vld [vmem:[#allocation10 + $0x70] sm:$0xff]  ;;  %v564_v26 = vld [vmem:[#allocation10 + $0x68] sm:$0xff] }
  0x64   :  { %824 = vmatpush3.msra.mxu0 %v127_v34  ;;  %343 = vmatpush1.msra.mxu1 %v238_v44  ;;  %v563_v27 = vld [vmem:[#allocation10 + $0x60] sm:$0xff]  ;;  %v562_v28 = vld [vmem:[#allocation10 + $0x58] sm:$0xff]  ;;  %v561_v29 = vld [vmem:[#allocation10 + $0x50] sm:$0xff] }
  0x65   :  { %825 = vmatprep.subr.mxu0 %v142_v36  ;;  %344 = vmatprep.subr.mxu1 %v1197_v0  ;;  %v560_v30 = vld [vmem:[#allocation10 + $0x48] sm:$0xff]  ;;  %v559_v31 = vld [vmem:[#allocation10 + $0x40] sm:$0xff]  ;;  %v558_v32 = vld [vmem:[#allocation10 + $0x38] sm:$0xff] }
  0x66   :  { %826 = vmatpush3.msra.mxu0 %v126_v37  ;;  %345 = vmatpush1.msra.mxu1 %v237_v46  ;;  %v557_v33 = vld [vmem:[#allocation10 + $0x30] sm:$0xff]  ;;  %v556_v34 = vld [vmem:[#allocation10 + $0x28] sm:$0xff]  ;;  %v555_v35 = vld [vmem:[#allocation10 + $0x20] sm:$0xff] }
  0x67   :  { %827 = vmatprep.subr.mxu0 %v141_v39  ;;  %346 = vmatprep.subr.mxu1 %v1197_v0  ;;  %v554_v36 = vld [vmem:[#allocation10 + $0x18] sm:$0xff]  ;;  %v553_v37 = vld [vmem:[#allocation10 + $0x10] sm:$0xff]  ;;  %v552_v38 = vld [vmem:[#allocation10 + $0x8] sm:$0xff] }
  0x68   :  { %828 = vmatpush3.msra.mxu0 %v125_v40  ;;  %347 = vmatpush1.msra.mxu1 %v236_v47  ;;  %v551_v39 = vld [vmem:[#allocation10] sm:$0xff]  ;;  %v1334_v40 = vld [vmem:[#allocation11 + $0x78] sm:$0xff]  ;;  %v1336_v41 = vld [vmem:[#allocation11 + $0x70] sm:$0xff] }
  0x69   :  { %829 = vmatprep.subr.mxu0 %v140_v42  ;;  %348 = vmatprep.subr.mxu1 %v1197_v0  ;;  %v1341_v42 = vld [vmem:[#allocation11 + $0x68] sm:$0xff]  ;;  %v1349_v44 = vld [vmem:[#allocation11 + $0x58] sm:$0xff]  ;;  %v1361_v47 = vld [vmem:[#allocation11 + $0x40] sm:$0xff] }
  0x6a   :  { %830 = vmatpush3.msra.mxu0 %v124_v43  ;;  %349 = vmatpush1.msra.mxu1 %v235_v48  ;;  %v1345_v43 = vld [vmem:[#allocation11 + $0x60] sm:$0xff]  ;;  %v1357_v46 = vld [vmem:[#allocation11 + $0x48] sm:$0xff]  ;;  %v1365_v48 = vld [vmem:[#allocation11 + $0x38] sm:$0xff] }
  0x6b   :  { %228 = vmatmul.mubr.f32.vlgmr.msra.gmra.mxu0 %v122_v45  ;;  %350 = vmatprep.subr.mxu1 %v1197_v0  ;;  %v1353_v45 = vld [vmem:[#allocation11 + $0x50] sm:$0xff] }
  0x6c   :  { %351 = vmatpush1.msra.mxu1 %v234_v49  ;;  %386 = vmatprep.mubr.f32.mxu1 %v283_v51  ;;  %v1369_v49 = vld [vmem:[#allocation11 + $0x30] sm:$0xff]  ;;  %v1377_v51 = vld [vmem:[#allocation11 + $0x20] sm:$0xff] }
  0x6d   :  { %352 = vmatprep.subr.mxu1 %v1197_v0  ;;  %894 = vmatprep.subr.mxu0 %v422_v52 }
  0x6e   :  { %353 = vmatpush1.msra.mxu1 %v233_v50  ;;  %895 = vmatpush3.msra.mxu0 %v422_v52  ;;  %v1373_v50 = vld [vmem:[#allocation11 + $0x28] sm:$0xff]  ;;  %v796_v52 = vld [vmem:[%s1449_s6] ss:$0 sm:$0xff] }
  0x6f   :  { %384 = vmatprep.subr.mxu1 %v1197_v0  ;;  %896 = vmatprep.subr.mxu0 %v421_v53  ;;  %v410_v0 = vld [vmem:[#allocation8 + $0x18] sm:$0xff] }
  0x70   :  { %897 = vmatpush3.msra.mxu0 %v421_v53 }
  0x71   :  { %898 = vmatprep.subr.mxu0 %v420_v54 }
  0x72   :  { %899 = vmatpush3.msra.mxu0 %v420_v54 }
  0x73   :  { %900 = vmatprep.subr.mxu0 %v419_v55 }
  0x74   :  { %901 = vmatpush3.msra.mxu0 %v419_v55 }
  0x75   :  { %902 = vmatprep.subr.mxu0 %v418_v56 }
  0x76   :  { %903 = vmatpush3.msra.mxu0 %v418_v56 }
  0x77   :  { %904 = vmatprep.subr.mxu0 %v417_v57 }
  0x78   :  { %905 = vmatpush3.msra.mxu0 %v417_v57 }
  0x79   :  { %906 = vmatprep.subr.mxu0 %v416_v58 }
  0x7a   :  { %907 = vmatpush3.msra.mxu0 %v416_v58 }
  0x7b   :  { %908 = vmatprep.subr.mxu0 %v415_v59 }
  0x7c   :  { %909 = vmatpush3.msra.mxu0 %v415_v59 }
  0x7d   :  { %910 = vmatprep.subr.mxu0 %v414_v60 }
  0x7e   :  { %911 = vmatpush3.msra.mxu0 %v414_v60 }
  0x7f   :  { %912 = vmatprep.subr.mxu0 %v413_v61 }
  0x80   :  { %913 = vmatpush3.msra.mxu0 %v413_v61 }
  0x81   :  { %914 = vmatprep.subr.mxu0 %v412_v62 }
  0x82   :  { %915 = vmatpush3.msra.mxu0 %v412_v62 }
  0x83   :  { %916 = vmatprep.subr.mxu0 %v411_v63 }
  0x84   :  { %917 = vmatpush3.msra.mxu0 %v411_v63 }
  0x85   :  { %918 = vmatprep.subr.mxu0 %v410_v0 }
  0x86   :  { %919 = vmatpush3.msra.mxu0 %v410_v0 }
  0x87   :  { %920 = vmatprep.subr.mxu0 %v409_v1 }
  0x88   :  { %921 = vmatpush3.msra.mxu0 %v409_v1 }
  0x89   :  { %922 = vmatprep.subr.mxu0 %v408_v14 }
  0x8a   :  { %923 = vmatpush3.msra.mxu0 %v408_v14 }
  0x8b   :  { %924 = vmatprep.subr.mxu0 %v407_v15 }
  0x8c   :  { %925 = vmatpush3.msra.mxu0 %v407_v15 }
  0x8d   :  { %970 = vmatprep.subr.mxu0 %v1334_v40 }
 0x12b   :  { %v831_v2 = vpop.f32.mrf.mxu0 }
 0x12d   :  { %v832_v4 = vpop.f32.mrf.mxu0 }
 0x12e   :  { %v833_v5 = vadd.f32 %v832_v4, %v831_v2 }
 0x130   :  { %v230_v6 = vadd.f32 %v833_v5, %v795_v3 }
 0x132   :  { %385 = vmatpush2.msra.mxu1 %v230_v6 }
 0x133   :  { %387 = vmatmul.mubr.f32.vlgmr.msra.gmra.mxu1 %v282_v7  ;;  %932 = vmatprep.subr.mxu1 %v566_v24 }
 0x134   :  { %391 = vmatprep.mubr.f32.mxu1 %v285_v8  ;;  %933 = vmatpush3.msra.mxu1 %v566_v24 }
 0x135   :  { %934 = vmatprep.subr.mxu1 %v565_v25 }
 0x136   :  { %935 = vmatpush3.msra.mxu1 %v565_v25 }
 0x137   :  { %392 = vmatmul.mubr.f32.gmra.mxu1 %v284_v9  ;;  %936 = vmatprep.subr.mxu1 %v564_v26 }
 0x138   :  { %396 = vmatprep.mubr.f32.mxu1 %v287_v10  ;;  %937 = vmatpush3.msra.mxu1 %v564_v26 }
 0x139   :  { %938 = vmatprep.subr.mxu1 %v563_v27 }
 0x13a   :  { %939 = vmatpush3.msra.mxu1 %v563_v27 }
 0x13b   :  { %397 = vmatmul.mubr.f32.gmra.mxu1 %v286_v11  ;;  %940 = vmatprep.subr.mxu1 %v562_v28 }
 0x13c   :  { %401 = vmatprep.mubr.f32.mxu1 %v289_v12  ;;  %941 = vmatpush3.msra.mxu1 %v562_v28 }
 0x13d   :  { %942 = vmatprep.subr.mxu1 %v561_v29 }
 0x13e   :  { %943 = vmatpush3.msra.mxu1 %v561_v29 }
 0x13f   :  { %402 = vmatmul.mubr.f32.gmra.mxu1 %v288_v13  ;;  %944 = vmatprep.subr.mxu1 %v560_v30 }
 0x140   :  { %945 = vmatpush3.msra.mxu1 %v560_v30 }
 0x141   :  { %946 = vmatprep.subr.mxu1 %v559_v31 }
 0x142   :  { %947 = vmatpush3.msra.mxu1 %v559_v31 }
 0x143   :  { %948 = vmatprep.subr.mxu1 %v558_v32 }
 0x144   :  { %949 = vmatpush3.msra.mxu1 %v558_v32 }
 0x145   :  { %950 = vmatprep.subr.mxu1 %v557_v33 }
 0x146   :  { %951 = vmatpush3.msra.mxu1 %v557_v33 }
 0x147   :  { %952 = vmatprep.subr.mxu1 %v556_v34 }
 0x148   :  { %953 = vmatpush3.msra.mxu1 %v556_v34 }
 0x149   :  { %954 = vmatprep.subr.mxu1 %v555_v35 }
 0x14a   :  { %955 = vmatpush3.msra.mxu1 %v555_v35 }
 0x14b   :  { %956 = vmatprep.subr.mxu1 %v554_v36 }
 0x14c   :  { %957 = vmatpush3.msra.mxu1 %v554_v36 }
 0x14d   :  { %958 = vmatprep.subr.mxu1 %v553_v37 }
 0x14e   :  { %959 = vmatpush3.msra.mxu1 %v553_v37  ;;  %v674_v37 = vld [vmem:[#allocation11 + $0x18] sm:$0xff] }
 0x14f   :  { %960 = vmatprep.subr.mxu1 %v552_v38 }
 0x150   :  { %961 = vmatpush3.msra.mxu1 %v552_v38  ;;  %v673_v38 = vld [vmem:[#allocation11 + $0x10] sm:$0xff] }
 0x151   :  { %962 = vmatprep.subr.mxu1 %v551_v39 }
 0x152   :  { %963 = vmatpush3.msra.mxu1 %v551_v39  ;;  %v672_v39 = vld [vmem:[#allocation11 + $0x8] sm:$0xff] }
 0x153   :  { %1008 = vmatprep.subr.mxu1 %v1334_v40 }
 0x1f3   :  { %v1322_v16 = vpop.f32.mrf.mxu1 }
 0x1f4   :  { %926 = vmatprep.mubr.f32.mxu0 %v1322_v16 }
 0x1f5   :  { %v390_v17 = vpop.f32.mrf.mxu1 }
 0x1f7   :  { %v1325_v18 = vpop.f32.mrf.mxu1 }
 0x1f8   :  { %927 = vmatmul.mubr.f32.vlgmr.msra.gmra.mxu0 %v1325_v18 }
 0x1f9   :  { %v395_v19 = vpop.f32.mrf.mxu1  ;;  %971 = vmatpush3.msra.mxu0 %v1334_v40 }
 0x1fa   :  { %972 = vmatprep.subr.mxu0 %v1336_v41 }
 0x1fb   :  { %v1328_v20 = vpop.f32.mrf.mxu1  ;;  %973 = vmatpush3.msra.mxu0 %v1336_v41 }
 0x1fc   :  { %929 = vmatprep.mubr.f32.mxu0 %v1328_v20  ;;  %974 = vmatprep.subr.mxu0 %v1341_v42 }
 0x1fd   :  { %v400_v21 = vpop.f32.mrf.mxu1  ;;  %975 = vmatpush3.msra.mxu0 %v1341_v42 }
 0x1fe   :  { %976 = vmatprep.subr.mxu0 %v1345_v43 }
 0x1ff   :  { %v1331_v22 = vpop.f32.mrf.mxu1  ;;  %977 = vmatpush3.msra.mxu0 %v1345_v43 }
 0x200   :  { %930 = vmatmul.mubr.f32.gmra.mxu0 %v1331_v22  ;;  %978 = vmatprep.subr.mxu0 %v1349_v44 }
 0x201   :  { %v405_v23 = vpop.f32.mrf.mxu1  ;;  %979 = vmatpush3.msra.mxu0 %v1349_v44 }
 0x202   :  { %980 = vmatprep.subr.mxu0 %v1353_v45 }
 0x203   :  { %981 = vmatpush3.msra.mxu0 %v1353_v45 }
 0x204   :  { %982 = vmatprep.subr.mxu0 %v1357_v46 }
 0x205   :  { %983 = vmatpush3.msra.mxu0 %v1357_v46 }
 0x206   :  { %984 = vmatprep.subr.mxu0 %v1361_v47 }
 0x207   :  { %985 = vmatpush3.msra.mxu0 %v1361_v47 }
 0x208   :  { %986 = vmatprep.subr.mxu0 %v1365_v48 }
 0x209   :  { %987 = vmatpush3.msra.mxu0 %v1365_v48 }
 0x20a   :  { %988 = vmatprep.subr.mxu0 %v1369_v49 }
 0x20b   :  { %989 = vmatpush3.msra.mxu0 %v1369_v49 }
 0x20c   :  { %990 = vmatprep.subr.mxu0 %v1373_v50 }
 0x20d   :  { %991 = vmatpush3.msra.mxu0 %v1373_v50 }
 0x20e   :  { %992 = vmatprep.subr.mxu0 %v1377_v51 }
 0x20f   :  { %993 = vmatpush3.msra.mxu0 %v1377_v51 }
 0x210   :  { %994 = vmatprep.subr.mxu0 %v674_v37 }
 0x211   :  { %995 = vmatpush3.msra.mxu0 %v674_v37 }
 0x212   :  { %996 = vmatprep.subr.mxu0 %v673_v38 }
 0x213   :  { %997 = vmatpush3.msra.mxu0 %v673_v38 }
 0x214   :  { %998 = vmatprep.subr.mxu0 %v672_v39 }
 0x215   :  { %999 = vmatpush3.msra.mxu0 %v672_v39 }
 0x2b8   :  { %v928_v53 = vpop.f32.mrf.mxu0 }
 0x2b9   :  { %v502_v54 = vadd.f32 %v928_v53, %v796_v52 }
 0x2ba   :  { %v496_v55 = vpop.f32.mrf.mxu0 }
 0x2bb   :  { %v516_v56 = vmul.f32 %v502_v54, %v502_v54  ;;  %v497_v57 = vadd.f32 %v796_v52, %v496_v55 }
 0x2bd   :  { %v520_v58 = vmul.f32 %v516_v56, %v502_v54  ;;  %v515_v59 = vmul.f32 %v497_v57, %v497_v57 }
 0x2bf   :  { %v524_v60 = vmul.f32 0.044715, %v520_v58  ;;  %v519_v61 = vmul.f32 %v515_v59, %v497_v57 }
 0x2c0   :  { %v931_v62 = vpop.f32.mrf.mxu0 }
 0x2c1   :  { %v528_v63 = vadd.f32 %v524_v60, %v502_v54  ;;  %v523_v0 = vmul.f32 0.044715, %v519_v61  ;;  %v512_v1 = vadd.f32 %v931_v62, %v796_v52 }
 0x2c2   :  { %v506_v2 = vpop.f32.mrf.mxu0 }
 0x2c3   :  { %v532_v3 = vmul.f32 0.7978846, %v528_v63  ;;  %v527_v4 = vadd.f32 %v523_v0, %v497_v57  ;;  %v518_v5 = vmul.f32 %v512_v1, %v512_v1  ;;  %v507_v6 = vadd.f32 %v796_v52, %v506_v2  ;;  %v798_v52 = vld [vmem:[%s1453_s10] ss:$0 sm:$0xff] }
 0x2c5   :  { %1051 = vtanh.f32 %v532_v3  ;;  %v531_v7 = vmul.f32 0.7978846, %v527_v4  ;;  %v522_v8 = vmul.f32 %v518_v5, %v512_v1  ;;  %v517_v9 = vmul.f32 %v507_v6, %v507_v6 }
 0x2c7   :  { %1053 = vtanh.f32 %v531_v7  ;;  %v526_v10 = vmul.f32 0.044715, %v522_v8  ;;  %v521_v11 = vmul.f32 %v517_v9, %v507_v6 }
 0x2c9   :  { %v530_v12 = vadd.f32 %v526_v10, %v512_v1  ;;  %v525_v13 = vmul.f32 0.044715, %v521_v11 }
 0x2cb   :  { %v534_v14 = vmul.f32 0.7978846, %v530_v12  ;;  %v529_v15 = vadd.f32 %v525_v13, %v507_v6 }
 0x2cd   :  { %1055 = vtanh.f32 %v534_v14  ;;  %v533_v17 = vmul.f32 0.7978846, %v529_v15 }
 0x2cf   :  { %1057 = vtanh.f32 %v533_v17 }
 0x2d2   :  { %v1052_v19 = vpop.eup %1051 }
 0x2d3   :  { %v540_v21 = vadd.f32 1.0, %v1052_v19 }
 0x2d4   :  { %v1054_v23 = vpop.eup %1053 }
 0x2d5   :  { %v539_v24 = vadd.f32 1.0, %v1054_v23  ;;  %v544_v25 = vmul.f32 0.5, %v540_v21 }
 0x2d7   :  { %v543_v26 = vmul.f32 0.5, %v539_v24  ;;  %v548_v29 = vmul.f32 %v544_v25, %v502_v54 }
 0x2d9   :  { %v547_v27 = vmul.f32 %v543_v26, %v497_v57 }
 0x2da   :  { %v1056_v28 = vpop.eup %1055 }
 0x2db   :  { %964 = vmatprep.mubr.f32.mxu1 %v547_v27  ;;  %v542_v30 = vadd.f32 1.0, %v1056_v28 }
 0x2dc   :  { %v1058_v31 = vpop.eup %1057  ;;  %965 = vmatmul.mubr.f32.vlgmr.msra.gmra.mxu1 %v548_v29 }
 0x2dd   :  { %v541_v32 = vadd.f32 1.0, %v1058_v31  ;;  %1024 = vmatpush3.msra.mxu1 %v1334_v40  ;;  %v546_v33 = vmul.f32 0.5, %v542_v30  ;;  %v671_v40 = vld [vmem:[#allocation11] sm:$0xff] }
 0x2de   :  { %1009 = vmatprep.subr.mxu1 %v1336_v41  ;;  %1000 = vmatprep.subr.mxu0 %v671_v40 }
 0x2df   :  { %v545_v34 = vmul.f32 0.5, %v541_v32  ;;  %1025 = vmatpush3.msra.mxu1 %v1336_v41  ;;  %v550_v36 = vmul.f32 %v546_v33, %v512_v1  ;;  %1001 = vmatpush3.msra.mxu0 %v671_v40 }
 0x2e0   :  { %1010 = vmatprep.subr.mxu1 %v1341_v42 }
 0x2e1   :  { %v549_v35 = vmul.f32 %v545_v34, %v507_v6  ;;  %1026 = vmatpush3.msra.mxu1 %v1341_v42  ;;  %v797_v42 = vld [vmem:[%s1451_s8] ss:$0 sm:$0xff] }
 0x2e2   :  { %1011 = vmatprep.subr.mxu1 %v1345_v43 }
 0x2e3   :  { %967 = vmatprep.mubr.f32.mxu1 %v549_v35  ;;  %1027 = vmatpush3.msra.mxu1 %v1345_v43 }
 0x2e4   :  { %968 = vmatmul.mubr.f32.gmra.mxu1 %v550_v36  ;;  %1012 = vmatprep.subr.mxu1 %v1349_v44 }
 0x2e5   :  { %1028 = vmatpush3.msra.mxu1 %v1349_v44 }
 0x2e6   :  { %1013 = vmatprep.subr.mxu1 %v1353_v45 }
 0x2e7   :  { %1029 = vmatpush3.msra.mxu1 %v1353_v45 }
 0x2e8   :  { %1014 = vmatprep.subr.mxu1 %v1357_v46 }
 0x2e9   :  { %1030 = vmatpush3.msra.mxu1 %v1357_v46 }
 0x2ea   :  { %1015 = vmatprep.subr.mxu1 %v1361_v47 }
 0x2eb   :  { %1031 = vmatpush3.msra.mxu1 %v1361_v47 }
 0x2ec   :  { %1016 = vmatprep.subr.mxu1 %v1365_v48 }
 0x2ed   :  { %1032 = vmatpush3.msra.mxu1 %v1365_v48 }
 0x2ee   :  { %1017 = vmatprep.subr.mxu1 %v1369_v49 }
 0x2ef   :  { %1033 = vmatpush3.msra.mxu1 %v1369_v49 }
 0x2f0   :  { %1018 = vmatprep.subr.mxu1 %v1373_v50 }
 0x2f1   :  { %1034 = vmatpush3.msra.mxu1 %v1373_v50 }
 0x2f2   :  { %1019 = vmatprep.subr.mxu1 %v1377_v51 }
 0x2f3   :  { %1035 = vmatpush3.msra.mxu1 %v1377_v51 }
 0x2f4   :  { %1020 = vmatprep.subr.mxu1 %v674_v37 }
 0x2f5   :  { %1036 = vmatpush3.msra.mxu1 %v674_v37 }
 0x2f6   :  { %1021 = vmatprep.subr.mxu1 %v673_v38 }
 0x2f7   :  { %1037 = vmatpush3.msra.mxu1 %v673_v38 }
 0x2f8   :  { %1022 = vmatprep.subr.mxu1 %v672_v39 }
 0x2f9   :  { %1038 = vmatpush3.msra.mxu1 %v672_v39 }
 0x2fa   :  { %1023 = vmatprep.subr.mxu1 %v671_v40 }
 0x2fb   :  { %1039 = vmatpush3.msra.mxu1 %v671_v40 }
 0x39c   :  { %v966_v41 = vpop.f32.mrf.mxu1 }
 0x39d   :  { %v653_v43 = vadd.f32 %v966_v41, %v1325_v18 }
 0x39e   :  { %v633_v44 = vpop.f32.mrf.mxu1 }
 0x39f   :  { %v664_v45 = vadd.f32 %v797_v42, %v653_v43  ;;  %v652_v46 = vadd.f32 %v633_v44, %v1322_v16 }
 0x3a1   :  { %668 = vst [vmem:[%s1454_s11 + $0x8] sm:$0xff] %v664_v45  ;;  %v663_v47 = vadd.f32 %v797_v42, %v652_v46 }
 0x3a3   :  { %667 = vst [vmem:[%s1454_s11] sm:$0xff] %v663_v47  ;;  %1002 = vmatprep.mubr.f32.mxu0 %v663_v47 }
 0x3a4   :  { %v969_v48 = vpop.f32.mrf.mxu1  ;;  %1003 = vmatmul.mubr.f32.vlgmr.msra.gmra.mxu0 %v664_v45 }
 0x3a5   :  { %v655_v49 = vadd.f32 %v969_v48, %v1331_v22 }
 0x3a6   :  { %v643_v50 = vpop.f32.mrf.mxu1 }
 0x3a7   :  { %v666_v18 = vadd.f32 %v797_v42, %v655_v49  ;;  %v654_v51 = vadd.f32 %v643_v50, %v1328_v20 }
 0x3a9   :  { %670 = vst [vmem:[%s1454_s11 + $0x18] sm:$0xff] %v666_v18  ;;  %v665_v16 = vadd.f32 %v797_v42, %v654_v51 }
 0x3ab   :  { %669 = vst [vmem:[%s1454_s11 + $0x10] sm:$0xff] %v665_v16  ;;  %1005 = vmatprep.mubr.f32.mxu1 %v665_v16 }
 0x3ac   :  { %1006 = vmatmul.mubr.f32.vlgmr.msra.gmra.mxu1 %v666_v18 }
 0x464   :  { %v1004_v22 = vpop.f32.mrf.mxu0 }
 0x465   :  { %v766_v53 = vadd.f32 %v1004_v22, %v798_v52 }
 0x466   :  { %v760_v54 = vpop.f32.mrf.mxu0 }
 0x467   :  { %780 = vst [vmem:[%s1455_s12 + $0x8] sm:$0xff] %v766_v53  ;;  %v761_v20 = vadd.f32 %v798_v52, %v760_v54 }
 0x469   :  { %779 = vst [vmem:[%s1455_s12] sm:$0xff] %v761_v20 }
 0x46c   :  { %v1007_v55 = vpop.f32.mrf.mxu1 }
 0x46d   :  { %v776_v56 = vadd.f32 %v1007_v55, %v798_v52 }
 0x46e   :  { %v770_v57 = vpop.f32.mrf.mxu1 }
 0x46f   :  { %782 = vst [vmem:[%s1455_s12 + $0x18] sm:$0xff] %v776_v56  ;;  %v771_v58 = vadd.f32 %v798_v52, %v770_v57 }
 0x471   :  { %781 = vst [vmem:[%s1455_s12 + $0x10] sm:$0xff] %v771_v58 }
 0x472   :  { %791 = vsyncpa [#allocation4], 1 }
 0x473   :  { %792 = vsyncpa [#allocation6], 1 }
 0x474   :  { %793 = vsyncpa [#allocation9], 1 }
 0x475   :  { %794 = vsyncpa [#allocation12], 1 }

</bundles_post_ra>
